<compile_context>
chip_gen: v7x
topology: tpu7x:2x2x1
jax: 0.10.0
libtpu: 0.0.40
codegen_flags: <defaults>
</compile_context>

<pallas_src>
import functools

import jax
import jax.numpy as jnp
from jax.experimental import pallas as pl
from jax.experimental.pallas import tpu as pltpu


def _round_up(x, m):
    return (x + m - 1) // m * m


def _fused_heads_kernel(x_ref, w_ref, b_ref, out_ref):
    # One lane-dense MXU matmul covering all three heads, plus a fused bias add.
    out_ref[...] = (
        jnp.dot(x_ref[...], w_ref[...], preferred_element_type=jnp.float32)
        + b_ref[...]
    )


def fpn_attr_predictor(x, params, *, tile_n=256):
    """Forward pass of FPNAttrPredictor.

    x: (N, C) or (N, C, 1, 1) float32
    returns (attr_scores, scores, bbox_deltas)
    """
    if x.ndim == 4:
        assert x.shape[2] == 1 and x.shape[3] == 1
        x = x.reshape(x.shape[0], -1)

    n, c = x.shape
    w_cls, b_cls = params["cls_w"], params["cls_b"]      # (C, num_cls), (1, num_cls)
    w_attr, b_attr = params["attr_w"], params["attr_b"]  # (C, num_attr), (1, num_attr)
    w_bbox, b_bbox = params["bbox_w"], params["bbox_b"]  # (C, 4*num_cls), (1, 4*num_cls)

    num_cls = w_cls.shape[1]
    num_attr = w_attr.shape[1]
    num_bbox = w_bbox.shape[1]
    out_dim = num_attr + num_cls + num_bbox
    out_pad = _round_up(out_dim, 128)        # lane-dense output slab
    lane_pad = out_pad - out_dim

    # Fuse the three heads: W_fused is (C, out_pad), b_fused is (1, out_pad).
    w_fused = jnp.concatenate(
        [w_attr, w_cls, w_bbox, jnp.zeros((c, lane_pad), x.dtype)], axis=1)
    b_fused = jnp.concatenate(
        [b_attr.reshape(1, -1), b_cls.reshape(1, -1), b_bbox.reshape(1, -1),
         jnp.zeros((1, lane_pad), x.dtype)], axis=1)

    # Row tile: multiple of 8 sublanes, capped by the (padded) ROI count.
    tile_n = _round_up(max(8, min(tile_n, _round_up(n, 8))), 8)
    n_pad = _round_up(n, tile_n)
    if n_pad != n:
        x = jnp.pad(x, ((0, n_pad - n), (0, 0)))

    grid = (n_pad // tile_n,)

    out = pl.pallas_call(
        _fused_heads_kernel,
        out_shape=jax.ShapeDtypeStruct((n_pad, out_pad), jnp.float32),
        grid_spec=pl.GridSpec(
            grid=grid,
            in_specs=[
                # x: pipelined over ROI tiles
                pl.BlockSpec((tile_n, c), lambda i: (i, 0)),
                # fused weight: resident across all grid steps
                pl.BlockSpec((c, out_pad), lambda i: (0, 0)),
                # fused bias: resident
                pl.BlockSpec((1, out_pad), lambda i: (0, 0)),
            ],
            out_specs=pl.BlockSpec((tile_n, out_pad), lambda i: (i, 0)),
        ),
        compiler_params=pltpu.CompilerParams(
            dimension_semantics=("parallel",)),   # v7x: shard ROI tiles across 2 TCs
    )(x, w_fused, b_fused)

    attr_scores = out[:n, :num_attr]
    scores = out[:n, num_attr:num_attr + num_cls]
    bbox_deltas = out[:n, num_attr + num_cls:out_dim]
    return attr_scores, scores, bbox_deltas


# Jitted wrapper so the weight fusion / padding / output slicing fuse with the call.
fpn_attr_predictor_jit = jax.jit(
    functools.partial(fpn_attr_predictor), static_argnames=("tile_n",))


def make_params(key, in_channels, num_classes, attr_num_classes):
    """Deterministic synthetic init matching the module's nn.init calls."""
    # TODO(synk): EMBEDDING_INIT=True path (h5py checkpoint for cls/attr heads) is
    # not reproducible in-script; synthetic normal init is used instead.
    k_cls, k_attr, k_bbox = jax.random.split(key, 3)
    num_bbox_reg_classes = num_classes  # CLS_AGNOSTIC_BBOX_REG = False
    params = {
        # cls_score: normal(std=0.01), bias 0
        "cls_w": (0.01 * jax.random.normal(k_cls, (in_channels, num_classes))
                  ).astype(jnp.float32),
        "cls_b": jnp.zeros((1, num_classes), jnp.float32),
        # attr_score: normal(std=0.01), bias 0
        "attr_w": (0.01 * jax.random.normal(k_attr, (in_channels, attr_num_classes))
                   ).astype(jnp.float32),
        "attr_b": jnp.zeros((1, attr_num_classes), jnp.float32),
        # bbox_pred: normal(std=0.001), bias 0
        "bbox_w": (0.001 * jax.random.normal(
            k_bbox, (in_channels, num_bbox_reg_classes * 4))).astype(jnp.float32),
        "bbox_b": jnp.zeros((1, num_bbox_reg_classes * 4), jnp.float32),
    }
    return params


if __name__ == "__main__":
    key = jax.random.PRNGKey(0)
    k_x, k_p = jax.random.split(key)

    N = 80              # number of ROIs (not a tile multiple -> exercises padding)
    IN_CHANNELS = 256   # representation size
    NUM_CLASSES = 16
    ATTR_NUM_CLASSES = 32

    # 4-D pooled features (N, C, 1, 1), exercising the view-to-2D path.
    x = jax.random.normal(k_x, (N, IN_CHANNELS, 1, 1), dtype=jnp.float32)
    params = make_params(k_p, IN_CHANNELS, NUM_CLASSES, ATTR_NUM_CLASSES)

    # Small tile so the parallel ROI grid is actually exercised (3 tiles of 32).
    attr_scores, scores, bbox_deltas = fpn_attr_predictor_jit(x, params, tile_n=32)
    jax.block_until_ready((attr_scores, scores, bbox_deltas))

    # Reference check against plain JAX.
    x2 = x.reshape(N, -1)
    hp = jax.lax.Precision.HIGHEST
    ref_attr = jnp.dot(x2, params["attr_w"], precision=hp) + params["attr_b"]
    ref_cls = jnp.dot(x2, params["cls_w"], precision=hp) + params["cls_b"]
    ref_bbox = jnp.dot(x2, params["bbox_w"], precision=hp) + params["bbox_b"]
    assert attr_scores.shape == (N, ATTR_NUM_CLASSES)
    assert scores.shape == (N, NUM_CLASSES)
    assert bbox_deltas.shape == (N, NUM_CLASSES * 4)
    assert jnp.allclose(attr_scores, ref_attr, atol=1e-4, rtol=1e-4)
    assert jnp.allclose(scores, ref_cls, atol=1e-4, rtol=1e-4)
    assert jnp.allclose(bbox_deltas, ref_bbox, atol=1e-4, rtol=1e-4)

    print("KERNEL_OK")
</pallas_src>

<mosaic_0001>
module attributes {stable_mosaic.version = 11 : i64} {
  func.func @_fused_heads_kernel(%arg0: i32, %arg1: memref<32x256xf32, #tpu.memory_space<vmem>>, %arg2: memref<256x128xf32, #tpu.memory_space<vmem>>, %arg3: memref<1x128xf32, #tpu.memory_space<vmem>>, %arg4: memref<32x128xf32, #tpu.memory_space<vmem>>) attributes {dimension_semantics = [#tpu.dimension_semantics<parallel>], iteration_bounds = array<i64: 3>, scalar_prefetch = 0 : i64, scratch_operands = 0 : i64, tpu.core_type = #tpu.core_type<tc>, window_params = [{transform_indices = @transform_0, window_bounds = array<i64: 32, 256>}, {pipeline_mode = #tpu.pipeline_mode<synchronous>, transform_indices = @transform_1, window_bounds = array<i64: 256, 128>}, {pipeline_mode = #tpu.pipeline_mode<synchronous>, transform_indices = @transform_2, window_bounds = array<i64: 1, 128>}, {transform_indices = @transform_3, window_bounds = array<i64: 32, 128>}]} {
    %c0 = arith.constant 0 : index
    %c0_0 = arith.constant 0 : index
    %0 = vector.load %arg1[%c0, %c0_0] : memref<32x256xf32, #tpu.memory_space<vmem>>, vector<32x256xf32>
    %c0_1 = arith.constant 0 : index
    %c0_2 = arith.constant 0 : index
    %1 = vector.load %arg2[%c0_1, %c0_2] : memref<256x128xf32, #tpu.memory_space<vmem>>, vector<256x128xf32>
    %cst = arith.constant dense<0.000000e+00> : vector<32x128xf32>
    %2 = tpu.matmul %0, %1, %cst {dimension_numbers = #tpu.dot_dimension_numbers<[1], [0], [0], [1], [0, 0, 1, 1], [], []>} : vector<32x256xf32>, vector<256x128xf32>, vector<32x128xf32> -> vector<32x128xf32>
    %c0_3 = arith.constant 0 : index
    %c0_4 = arith.constant 0 : index
    %3 = vector.load %arg3[%c0_3, %c0_4] : memref<1x128xf32, #tpu.memory_space<vmem>>, vector<1x128xf32>
    %4 = vector.broadcast %3 : vector<1x128xf32> to vector<32x128xf32>
    %5 = arith.addf %2, %4 : vector<32x128xf32>
    %c0_5 = arith.constant 0 : index
    %c0_6 = arith.constant 0 : index
    %6 = vector.load %arg4[%c0_5, %c0_6] : memref<32x128xf32, #tpu.memory_space<vmem>>, vector<32x128xf32>
    tpu.vector_store %arg4[%c0_5, %c0_6], %5 {strides = array<i32>} : memref<32x128xf32, #tpu.memory_space<vmem>>, vector<32x128xf32>,
    return
  }
  func.func @transform_0(%arg0: i32) -> (i32, i32) {
    %c0_i32 = arith.constant 0 : i32
    %c0_i32_0 = arith.constant 0 : i32
    return %arg0, %c0_i32 : i32, i32
  }
  func.func @transform_1(%arg0: i32) -> (i32, i32) {
    %c0_i32 = arith.constant 0 : i32
    %c0_i32_0 = arith.constant 0 : i32
    %c0_i32_1 = arith.constant 0 : i32
    return %c0_i32, %c0_i32_0 : i32, i32
  }
  func.func @transform_2(%arg0: i32) -> (i32, i32) {
    %c0_i32 = arith.constant 0 : i32
    %c0_i32_0 = arith.constant 0 : i32
    %c0_i32_1 = arith.constant 0 : i32
    return %c0_i32, %c0_i32_0 : i32, i32
  }
  func.func @transform_3(%arg0: i32) -> (i32, i32) {
    %c0_i32 = arith.constant 0 : i32
    %c0_i32_0 = arith.constant 0 : i32
    return %arg0, %c0_i32 : i32, i32
  }
}

</mosaic_0001>

<bundles_post_ra>
// kernel: fpn_attr_predictor.1
= control target key start
LH: loop header
LB: loop body
LE: loop exit
PB: predicated region body
PF: predicated region fallthrough
CT: control target
= control target key end

     0   :  { %s511_s12 = smov 0   ;;  %s641_s0 = inlined_call_operand.vmem [shape: f32[96,256], index: 0, kind: input, shape index: {}]   ;;  %s642_s1 = inlined_call_operand.vmem [shape: f32[256,128], index: 1, kind: input, shape index: {}]   ;;  %s643_s2 = inlined_call_operand.vmem [shape: f32[1,128], index: 2, kind: input, shape index: {}]   ;;  %s644_s3 = inlined_call_operand.vmem [shape: f32[96,128], index: 3, kind: output, shape index: {}]  }
   0x1 LB: > { %s369_s13 = sadd.s32 4294967295, %s489_s12   ;;  %p373_p0 = scmp.ge.s32.totalorder %s489_s12, 1  ;;  %s489_s12 = sphi %s511_s12, %s13_s12  }
   0x2   : > { %p139_p1 = scmp.lt.s32.totalorder %s489_s12, 4 }
   0x4   : > { %p140_p2 = pnand %p373_p0, %p139_p1 }
   0x5   : > { %v201_v0 = vld [vmem:[%s642_s1 + $0x80] sm:$0xff] (!%p140_p2)  ;;  %v202_v1 = vld [vmem:[%s642_s1 + $0x88] sm:$0xff] (!%p140_p2)  ;;  %s374_s20 = sshll.u32 (!%p140_p2), %s369_s13, 2  ;;  %v203_v5 = vld [vmem:[%s642_s1 + $0x90] sm:$0xff] (!%p140_p2) }
   0x6   : > { %143 = sbr.rel (%p140_p2) target bundleno = 263 (0x107), region = 32  ;;  %v185_v2 = vld [vmem:[%s642_s1] sm:$0xff] (!%p140_p2)  ;;  %v427_v3 = vpack.c.bf16 (!%p140_p2), %v202_v1, %v201_v0  ;;  %v186_v4 = vld [vmem:[%s642_s1 + $0x8] sm:$0xff] (!%p140_p2)  ;;  %v204_v6 = vld [vmem:[%s642_s1 + $0x98] sm:$0xff] (!%p140_p2)  ;;  %p165_p3 = scmp.lt.s32.totalorder (!%p140_p2), %s374_s20, 11 }
   0x7   : > { %v429_v7 = vpack.c.bf16 (!%p140_p2), %v186_v4, %v185_v2  ;;  %v431_v8 = vpack.c.bf16 (!%p140_p2), %v204_v6, %v203_v5  ;;  %v187_v9 = vld [vmem:[%s642_s1 + $0x10] sm:$0xff] (!%p140_p2)  ;;  %v188_v10 = vld [vmem:[%s642_s1 + $0x18] sm:$0xff] (!%p140_p2)  ;;  %v205_v11 = vld [vmem:[%s642_s1 + $0xa0] sm:$0xff] (!%p140_p2) }
   0x8   : > { %428 = vmatprep.subr.bf16.mxu0 (!%p140_p2), %v427_v3  ;;  %459 = vmatprep.subr.bf16.mxu1 (!%p140_p2), %v427_v3  ;;  %v206_v12 = vld [vmem:[%s642_s1 + $0xa8] sm:$0xff] (!%p140_p2)  ;;  %v433_v13 = vpack.c.bf16 (!%p140_p2), %v188_v10, %v187_v9  ;;  %v189_v15 = vld [vmem:[%s642_s1 + $0x20] sm:$0xff] (!%p140_p2)  ;;  %v207_v17 = vld [vmem:[%s642_s1 + $0xb0] sm:$0xff] (!%p140_p2) }
   0x9   : > { %430 = vmatpush3.bf16.msra.mxu0 (!%p140_p2), %v429_v7  ;;  %467 = vmatpush3.bf16.msra.mxu1 (!%p140_p2), %v429_v7  ;;  %v435_v14 = vpack.c.bf16 (!%p140_p2), %v206_v12, %v205_v11  ;;  %v190_v16 = vld [vmem:[%s642_s1 + $0x28] sm:$0xff] (!%p140_p2)  ;;  %v208_v18 = vld [vmem:[%s642_s1 + $0xb8] sm:$0xff] (!%p140_p2)  ;;  %v191_v21 = vld [vmem:[%s642_s1 + $0x30] sm:$0xff] (!%p140_p2) }
   0xa   : > { %432 = vmatprep.subr.bf16.mxu0 (!%p140_p2), %v431_v8  ;;  %460 = vmatprep.subr.bf16.mxu1 (!%p140_p2), %v431_v8  ;;  %v437_v19 = vpack.c.bf16 (!%p140_p2), %v190_v16, %v189_v15  ;;  %v439_v20 = vpack.c.bf16 (!%p140_p2), %v208_v18, %v207_v17  ;;  %v192_v22 = vld [vmem:[%s642_s1 + $0x38] sm:$0xff] (!%p140_p2)  ;;  %v209_v23 = vld [vmem:[%s642_s1 + $0xc0] sm:$0xff] (!%p140_p2)  ;;  %v210_v24 = vld [vmem:[%s642_s1 + $0xc8] sm:$0xff] (!%p140_p2) }
   0xb   : > { %v441_v27 = vpack.c.bf16 (!%p140_p2), %v192_v22, %v191_v21  ;;  %v443_v28 = vpack.c.bf16 (!%p140_p2), %v210_v24, %v209_v23  ;;  %v193_v29 = vld [vmem:[%s642_s1 + $0x40] sm:$0xff] (!%p140_p2)  ;;  %v194_v30 = vld [vmem:[%s642_s1 + $0x48] sm:$0xff] (!%p140_p2)  ;;  %v211_v31 = vld [vmem:[%s642_s1 + $0xd0] sm:$0xff] (!%p140_p2) }
   0xc   : > { %v212_v32 = vld [vmem:[%s642_s1 + $0xd8] sm:$0xff] (!%p140_p2)  ;;  %v445_v33 = vpack.c.bf16 (!%p140_p2), %v194_v30, %v193_v29  ;;  %v195_v35 = vld [vmem:[%s642_s1 + $0x50] sm:$0xff] (!%p140_p2)  ;;  %v213_v37 = vld [vmem:[%s642_s1 + $0xe0] sm:$0xff] (!%p140_p2) }
   0xd   : > { %s646_s20 = smov (!%p165_p3, %s374_s20), 11  ;;  %434 = vmatpush3.bf16.msra.mxu0 %v433_v13  ;;  %468 = vmatpush3.bf16.msra.mxu1 %v433_v13  ;;  %v447_v34 = vpack.c.bf16 %v212_v32, %v211_v31  ;;  %v196_v36 = vld [vmem:[%s642_s1 + $0x58] sm:$0xff]  ;;  %v214_v38 = vld [vmem:[%s642_s1 + $0xe8] sm:$0xff]  ;;  %v197_v41 = vld [vmem:[%s642_s1 + $0x60] sm:$0xff] }
   0xe   : > { %s382_s13 = sshll.u32 %s646_s20, 4  ;;  %436 = vmatprep.subr.bf16.mxu0 %v435_v14  ;;  %461 = vmatprep.subr.bf16.mxu1 %v435_v14  ;;  %v449_v39 = vpack.c.bf16 %v196_v36, %v195_v35  ;;  %v451_v40 = vpack.c.bf16 %v214_v38, %v213_v37  ;;  %v198_v42 = vld [vmem:[%s642_s1 + $0x68] sm:$0xff]  ;;  %v215_v43 = vld [vmem:[%s642_s1 + $0xf0] sm:$0xff]  ;;  %v216_v44 = vld [vmem:[%s642_s1 + $0xf8] sm:$0xff]  ;;  %s378_s7 = sshll.u32 %s646_s20, 3 }
   0xf   : > { %s567_s21 = scalar_lea.vmem %s641_s0, %s382_s13  ;;  %v453_v45 = vpack.c.bf16 %v198_v42, %v197_v41  ;;  %v455_v46 = vpack.c.bf16 %v216_v44, %v215_v43  ;;  %v199_v47 = vld [vmem:[%s642_s1 + $0x70] sm:$0xff]  ;;  %v200_v48 = vld [vmem:[%s642_s1 + $0x78] sm:$0xff]  ;;  %v379_v58 = vld [vmem:[%s643_s2] ss:$0 sm:$0xff]  ;;  %s175_s13 = scalar_lea.vmem %s644_s3, %s378_s7 }
  0x10   : > { %v178_v25 = vld [vmem:[%s567_s21 + $0x8] sm:$0xff]  ;;  %v457_v49 = vpack.c.bf16 %v200_v48, %v199_v47  ;;  %v177_v50 = vld [vmem:[%s567_s21] sm:$0xff]  ;;  %v180_v52 = vld [vmem:[%s567_s21 + $0x18] sm:$0xff] }
  0x11   : > { %288 = vmatprep.mubr.f32.mxu0 %v178_v25  ;;  %v182_v26 = vld [vmem:[%s567_s21 + $0x28] sm:$0xff]  ;;  %438 = vmatpush3.bf16.msra.mxu0 %v437_v19  ;;  %v181_v51 = vld [vmem:[%s567_s21 + $0x20] sm:$0xff]  ;;  %v184_v53 = vld [vmem:[%s567_s21 + $0x38] sm:$0xff] }
  0x12   : > { %469 = vmatpush3.bf16.msra.mxu1 %v437_v19  ;;  %440 = vmatprep.subr.bf16.mxu0 %v439_v20  ;;  %v179_v54 = vld [vmem:[%s567_s21 + $0x10] sm:$0xff] }
  0x13   : > { %462 = vmatprep.subr.bf16.mxu1 %v439_v20  ;;  %298 = vmatprep.mubr.f32.mxu1 %v182_v26  ;;  %v183_v55 = vld [vmem:[%s567_s21 + $0x30] sm:$0xff] }
  0x15   : > { %442 = vmatpush3.bf16.msra.mxu0 %v441_v27 }
  0x16   : > { %470 = vmatpush3.bf16.msra.mxu1 %v441_v27  ;;  %444 = vmatprep.subr.bf16.mxu0 %v443_v28 }
  0x17   : > { %463 = vmatprep.subr.bf16.mxu1 %v443_v28 }
  0x19   : > { %446 = vmatpush3.bf16.msra.mxu0 %v445_v33 }
  0x1a   : > { %471 = vmatpush3.bf16.msra.mxu1 %v445_v33  ;;  %448 = vmatprep.subr.bf16.mxu0 %v447_v34 }
  0x1b   : > { %464 = vmatprep.subr.bf16.mxu1 %v447_v34 }
  0x1d   : > { %450 = vmatpush3.bf16.msra.mxu0 %v449_v39 }
  0x1e   : > { %472 = vmatpush3.bf16.msra.mxu1 %v449_v39  ;;  %452 = vmatprep.subr.bf16.mxu0 %v451_v40 }
  0x1f   : > { %465 = vmatprep.subr.bf16.mxu1 %v451_v40 }
  0x21   : > { %454 = vmatpush3.bf16.msra.mxu0 %v453_v45 }
  0x22   : > { %473 = vmatpush3.bf16.msra.mxu1 %v453_v45  ;;  %456 = vmatprep.subr.bf16.mxu0 %v455_v46 }
  0x23   : > { %466 = vmatprep.subr.bf16.mxu1 %v455_v46 }
  0x25   : > { %458 = vmatpush3.bf16.msra.mxu0 %v457_v49 }
  0x26   : > { %474 = vmatpush3.bf16.msra.mxu1 %v457_v49 }
  0x28   : > { %289 = vmatmul.mubr.f32.vlgmr.msra.gmra.mrb[0].mxu0 %v177_v50 }
  0x29   : > { %299 = vmatmul.mubr.f32.vlgmr.msra.gmra.mrb[0].mxu1 %v181_v51  ;;  %293 = vmatprep.mubr.f32.mxu0 %v180_v52 }
  0x2a   : > { %303 = vmatprep.mubr.f32.mxu1 %v184_v53 }
  0x2c   : > { %294 = vmatmul.mubr.f32.gmra.mrb[2].mxu0 %v179_v54 }
  0x2d   : > { %304 = vmatmul.mubr.f32.gmra.mrb[2].mxu1 %v183_v55 }
  0xfb   : > { %v415_v56 = vpop.f32.mrb[0].mxu0 }
  0xfc   : > { %v421_v57 = vpop.f32.mrb[0].mxu1  ;;  %v416_v59 = vpop.f32.mrb[1].mxu0 }
  0xfd   : > { %v422_v60 = vpop.f32.mrb[1].mxu1  ;;  %v417_v61 = vadd.f32 %v416_v59, %v415_v56 }
  0xfe   : > { %v423_v62 = vadd.f32 %v422_v60, %v421_v57 }
  0xff   : > { %v291_v63 = vadd.f32 %v417_v61, %v379_v58  ;;  %v418_v1 = vpop.f32.mrb[2].mxu0 }
 0x100   : > { %v301_v0 = vadd.f32 %v423_v62, %v379_v58  ;;  %v424_v2 = vpop.f32.mrb[2].mxu1  ;;  %v419_v3 = vpop.f32.mrb[3].mxu0 }
 0x101   : > { %v425_v4 = vpop.f32.mrb[3].mxu1  ;;  %309 = vst [vmem:[%s175_s13] sm:$0xff] %v291_v63  ;;  %v420_v5 = vadd.f32 %v419_v3, %v418_v1 }
 0x102   : > { %311 = vst [vmem:[%s175_s13 + $0x10] sm:$0xff] %v301_v0  ;;  %v426_v6 = vadd.f32 %v425_v4, %v424_v2 }
 0x103   : > { %v296_v7 = vadd.f32 %v420_v5, %v379_v58 }
 0x104   : > { %v306_v8 = vadd.f32 %v426_v6, %v379_v58 }
 0x105   : > { %310 = vst [vmem:[%s175_s13 + $0x8] sm:$0xff] %v296_v7 }
 0x106   : > { %312 = vst [vmem:[%s175_s13 + $0x18] sm:$0xff] %v306_v8 }
 0x107 PF: > { %s13_s12 = sadd.s32 1, %s489_s12  }
 0x108   : > { %p10_p4 = scmp.ge.s32.totalorder %s13_s12, 5  }
 0x10a   :  { %12 = sbr.rel (!%p10_p4) target bundleno = 1 (0x1), region = 62 }

</bundles_post_ra>
